<compile_context>
chip_gen: v7x
topology: tpu7x:2x2x1
jax: 0.10.0
libtpu: 0.0.40
codegen_flags: <defaults>
</compile_context>

<pallas_src>
import functools

import jax
import jax.numpy as jnp
from jax.experimental import pallas as pl
from jax.experimental.pallas import tpu as pltpu

EPS = 1e-5
_GRAN = 16                      # row-tile granularity (covers f32 & bf16 sublane packing)
_TILE_VMEM_BUDGET = 24 << 20    # target for double-buffered x/out tiles (fits every chip)


# --------------------------------------------------------------------------- kernels
def _mlp_kernel_packed(x_ref, w_ref, seg_ref, p_ref, o_ref, *, inv_d):
    """Fused Linear + LayerNorm + PReLU on a lane-dense packed slab.

    x_ref  : (tile, P*F_in)   P original rows packed per slab row (bf16/f32)
    w_ref  : (P*F_in, P*D)    block-diagonal Linear weight (P*D lane-dense)
    seg_ref: (P*D, P*D)       block-diagonal ones (segment-sum matrix), f32
    p_ref  : (4, P*D)         P-tiled constants: bias, gamma, beta, alpha
    o_ref  : (tile, P*D)
    """
    y = jnp.dot(x_ref[...], w_ref[...], preferred_element_type=jnp.float32)
    y = y + p_ref[0:1, :]                                   # bias

    # Segmented (per original row) LayerNorm stats via MXU: the result is
    # already broadcast across each D-lane segment -> everything stays
    # lane-dense, no masked lane reductions / partial stores.
    seg = seg_ref[...]
    mean = jnp.dot(y, seg, preferred_element_type=jnp.float32) * inv_d
    yc = y - mean                                           # two-pass (mean-shifted) var
    var = jnp.dot(yc * yc, seg, preferred_element_type=jnp.float32) * inv_d
    y_norm = yc * jax.lax.rsqrt(var + EPS)
    y_norm = y_norm * p_ref[1:2, :] + p_ref[2:3, :]         # gamma, beta

    out = jnp.where(y_norm > 0, y_norm, p_ref[3:4, :] * y_norm)   # PReLU
    o_ref[...] = out.astype(o_ref.dtype)


def _mlp_kernel_plain(x_ref, w_ref, p_ref, o_ref, *, inv_d):
    """General-D fallback (D does not divide 128): straightforward fused pass."""
    y = jnp.dot(x_ref[...], w_ref[...], preferred_element_type=jnp.float32)
    y = y + p_ref[0:1, :]
    mean = jnp.sum(y, axis=-1, keepdims=True) * inv_d
    yc = y - mean
    var = jnp.sum(yc * yc, axis=-1, keepdims=True) * inv_d
    y_norm = yc * jax.lax.rsqrt(var + EPS)
    y_norm = y_norm * p_ref[1:2, :] + p_ref[2:3, :]
    out = jnp.where(y_norm > 0, y_norm, p_ref[3:4, :] * y_norm)
    o_ref[...] = out.astype(o_ref.dtype)


# --------------------------------------------------------------------------- helpers
def _round_up(n, m):
    return ((n + m - 1) // m) * m


def _choose_tile(rows, tile_n, bytes_per_row):
    """Row tile: >= 2 grid steps whenever there is >= 2 tiles of work (so the
    'parallel' axis shards across both v7x TensorCores), capped by tile_n and
    by the double-buffered VMEM budget."""
    cap = max(_round_up(tile_n, _GRAN), _GRAN)
    if rows <= _GRAN:
        tile = _GRAN
    elif rows <= 2 * cap:
        tile = min(_round_up((rows + 1) // 2, _GRAN), cap)
    else:
        tile = cap
    while tile > _GRAN and 2 * tile * bytes_per_row > _TILE_VMEM_BUDGET:
        tile = max(_GRAN, _round_up(tile // 2, _GRAN))
    return tile


# --------------------------------------------------------------------------- wrapper
def mlp_module_forward(x, w_t, bias, gamma, beta, alpha, *,
                       tile_n=1024, use_bf16_matmul=True, out_dtype=None):
    """Eval-mode MLP_module.forward (Linear -> LayerNorm -> PReLU).

    x: [N, F_in].  w_t: [F_in, D] (torch Linear weight transposed).
    bias/gamma/beta/alpha: per-feature vectors of length D.
    """
    N, F_in = x.shape
    D = w_t.shape[1]
    out_dtype = x.dtype if out_dtype is None else out_dtype
    mm_dtype = jnp.bfloat16 if use_bf16_matmul else x.dtype

    pack = (D < 128) and (128 % D == 0)      # lane-dense packed-slab path
    P = (128 // D) if pack else 1
    k_in = P * F_in
    n_out = P * D

    in_bytes = jnp.dtype(mm_dtype).itemsize
    out_bytes = jnp.dtype(out_dtype).itemsize
    bytes_per_row = k_in * in_bytes + n_out * out_bytes

    n_rows = -(-N // P)                       # packed rows of real data
    tile = _choose_tile(n_rows, tile_n, bytes_per_row)
    n_rows_pad = _round_up(n_rows, tile)
    grid = (n_rows_pad // tile,)
    n_pad = n_rows_pad * P                    # original rows after padding

    # --- operands ------------------------------------------------------------
    x_p = x
    if n_pad != N:
        # Padded rows produce finite garbage (rsqrt(var+eps) is finite),
        # never NaNs; they are sliced off after the call.
        x_p = jnp.pad(x_p, ((0, n_pad - N), (0, 0)))
    x_p = x_p.astype(mm_dtype)

    if pack:
        # (N, F_in) row-major -> (N/P, P*F_in): bit-identical view.
        x_p = x_p.reshape(n_rows_pad, k_in)
        w_op = jnp.kron(jnp.eye(P, dtype=w_t.dtype), w_t).astype(mm_dtype)      # block-diag
        seg = jnp.kron(jnp.eye(P, dtype=jnp.float32),
                       jnp.ones((D, D), dtype=jnp.float32))                     # segment sums
        tile_vec = lambda v: jnp.tile(v.reshape(D).astype(jnp.float32), P)
    else:
        # TODO(synk): when D is within ~25% of a multiple of 128, zero-pad the
        # weight columns to round_up(D, 128) instead to get unmasked stores.
        w_op = w_t.astype(mm_dtype)
        seg = None
        tile_vec = lambda v: v.reshape(D).astype(jnp.float32)

    params = jnp.stack([tile_vec(bias), tile_vec(gamma),
                        tile_vec(beta), tile_vec(alpha)], axis=0)   # (4, n_out)

    # --- VMEM budget & cost estimate ------------------------------------------
    const_bytes = w_op.size * in_bytes + params.size * 4 + (seg.size * 4 if pack else 0)
    vmem_need = 2 * tile * bytes_per_row + 2 * const_bytes          # double-buffered
    vmem_limit = int(min(max(2 * vmem_need, 16 << 20), 48 << 20))   # safe on v5e/v6e/v7x

    flops = 2 * n_pad * F_in * D
    if pack:
        flops += 2 * 2 * n_rows_pad * n_out * n_out                 # two stats matmuls
    cost = pl.CostEstimate(
        flops=int(flops),
        transcendentals=int(n_pad),                                 # one rsqrt per row
        bytes_accessed=int(x_p.size * in_bytes + const_bytes
                           + n_rows_pad * n_out * out_bytes),
    )

    # --- pallas_call -----------------------------------------------------------
    inv_d = float(1.0 / D)
    if pack:
        kernel = functools.partial(_mlp_kernel_packed, inv_d=inv_d)
        in_specs = [
            pl.BlockSpec((tile, k_in), lambda i: (i, 0)),      # x row tile
            pl.BlockSpec((k_in, n_out), lambda i: (0, 0)),     # block-diag weight (invariant)
            pl.BlockSpec((n_out, n_out), lambda i: (0, 0)),    # segment-sum matrix (invariant)
            pl.BlockSpec((4, n_out), lambda i: (0, 0)),        # packed constants (invariant)
        ]
        operands = (x_p, w_op, seg, params)
    else:
        kernel = functools.partial(_mlp_kernel_plain, inv_d=inv_d)
        in_specs = [
            pl.BlockSpec((tile, k_in), lambda i: (i, 0)),
            pl.BlockSpec((k_in, n_out), lambda i: (0, 0)),
            pl.BlockSpec((4, n_out), lambda i: (0, 0)),
        ]
        operands = (x_p, w_op, params)

    out = pl.pallas_call(
        kernel,
        out_shape=jax.ShapeDtypeStruct((n_rows_pad, n_out), out_dtype),
        grid_spec=pl.GridSpec(
            grid=grid,
            in_specs=in_specs,
            out_specs=pl.BlockSpec((tile, n_out), lambda i: (i, 0)),
        ),
        compiler_params=pltpu.CompilerParams(
            dimension_semantics=("parallel",),
            vmem_limit_bytes=vmem_limit),
        cost_estimate=cost,
    )(*operands)

    if pack:
        out = out.reshape(n_pad, D)      # bit-identical row-major view back to (rows, D)
    if n_pad != N:
        out = out[:N]
    return out


# --------------------------------------------------------------------------- reference
def reference_forward(x, w_t, bias, gamma, beta, alpha, *, bf16_matmul=False):
    if bf16_matmul:
        y = jnp.dot(x.astype(jnp.bfloat16), w_t.astype(jnp.bfloat16),
                    preferred_element_type=jnp.float32)
    else:
        y = x.astype(jnp.float32) @ w_t.astype(jnp.float32)
    y = y + bias.reshape(1, -1)
    mean = jnp.mean(y, axis=-1, keepdims=True)
    var = jnp.mean((y - mean) ** 2, axis=-1, keepdims=True)
    yn = (y - mean) / jnp.sqrt(var + EPS) * gamma.reshape(1, -1) + beta.reshape(1, -1)
    return jnp.where(yn > 0, yn, alpha.reshape(1, -1) * yn)


# --------------------------------------------------------------------------- demo
if __name__ == "__main__":
    key = jax.random.PRNGKey(0)

    def make_case(case_key, n, f_in, d):
        k_x, k_w, k_b, _ = jax.random.split(case_key, 4)
        x = jax.random.normal(k_x, (n, f_in), dtype=jnp.float32)
        w = jax.random.normal(k_w, (d, f_in), dtype=jnp.float32) * 0.1   # torch [out, in]
        bias = jax.random.normal(k_b, (d,), dtype=jnp.float32) * 0.01
        gamma = jnp.ones((d,), dtype=jnp.float32)
        beta = jnp.zeros((d,), dtype=jnp.float32)
        alpha = jnp.full((d,), 0.25, dtype=jnp.float32)                  # PReLU default init
        return x, w.T, bias, gamma, beta, alpha

    def check(case_key, n, f_in, out_dim, heads):
        d = out_dim * heads
        x, w_t, bias, gamma, beta, alpha = make_case(case_key, n, f_in, d)
        out = jax.block_until_ready(
            mlp_module_forward(x, w_t, bias, gamma, beta, alpha))
        assert out.shape == (n, d)
        ref_bf16 = reference_forward(x, w_t, bias, gamma, beta, alpha, bf16_matmul=True)
        ref_f32 = reference_forward(x, w_t, bias, gamma, beta, alpha, bf16_matmul=False)
        assert jnp.allclose(out, ref_bf16, atol=2e-2, rtol=2e-2), \
            f"mismatch vs bf16-rounded reference (N={n}, D={d})"
        assert jnp.allclose(out, ref_f32, atol=5e-2, rtol=5e-2), \
            f"mismatch vs f32 reference (N={n}, D={d})"

    k1, k2, k3 = jax.random.split(key, 3)
    # Module-consistent small shape: 16 nodes, input_dim=8, output_dim=8, head_num=4 (D=32).
    check(k1, n=16, f_in=8, out_dim=8, heads=4)     # packed lane-dense path, 1 grid step
    # Row padding + multi-step grid (both v7x TensorCores get work).
    check(k2, n=200, f_in=8, out_dim=8, heads=4)    # packed lane-dense path, 2 grid steps
    # D=48 does not divide 128 -> exercises the general fallback path.
    check(k3, n=40, f_in=8, out_dim=12, heads=4)

    # Interface parity: edge_attr / edge_index / sorted `batch` are accepted by
    # the torch forward but do not affect eval-mode LayerNorm results.
    # TODO(synk): training-mode Bernoulli graph/feature dropout, nn.Dropout and
    # unsorted-`batch` row regrouping are not implemented (eval-mode semantics).
    print("KERNEL_OK")
</pallas_src>

<mosaic_0001>
module attributes {stable_mosaic.version = 11 : i64} {
  func.func @_mlp_kernel_packed(%arg0: i32, %arg1: memref<16x32xbf16, #tpu.memory_space<vmem>>, %arg2: memref<32x128xbf16, #tpu.memory_space<vmem>>, %arg3: memref<128x128xf32, #tpu.memory_space<vmem>>, %arg4: memref<4x128xf32, #tpu.memory_space<vmem>>, %arg5: memref<16x128xf32, #tpu.memory_space<vmem>>) attributes {dimension_semantics = [#tpu.dimension_semantics<parallel>], iteration_bounds = array<i64: 1>, scalar_prefetch = 0 : i64, scratch_operands = 0 : i64, tpu.core_type = #tpu.core_type<tc>, window_params = [{transform_indices = @transform_0, window_bounds = array<i64: 16, 32>}, {pipeline_mode = #tpu.pipeline_mode<synchronous>, transform_indices = @transform_1, window_bounds = array<i64: 32, 128>}, {pipeline_mode = #tpu.pipeline_mode<synchronous>, transform_indices = @transform_2, window_bounds = array<i64: 128, 128>}, {pipeline_mode = #tpu.pipeline_mode<synchronous>, transform_indices = @transform_3, window_bounds = array<i64: 4, 128>}, {transform_indices = @transform_4, window_bounds = array<i64: 16, 128>}]} {
    %c0 = arith.constant 0 : index
    %c0_0 = arith.constant 0 : index
    %0 = vector.load %arg1[%c0, %c0_0] : memref<16x32xbf16, #tpu.memory_space<vmem>>, vector<16x32xbf16>
    %c0_1 = arith.constant 0 : index
    %c0_2 = arith.constant 0 : index
    %1 = vector.load %arg2[%c0_1, %c0_2] : memref<32x128xbf16, #tpu.memory_space<vmem>>, vector<32x128xbf16>
    %cst = arith.constant dense<0.000000e+00> : vector<16x128xf32>
    %2 = tpu.matmul %0, %1, %cst {dimension_numbers = #tpu.dot_dimension_numbers<[1], [0], [0], [1], [0, 0, 1, 1], [], []>} : vector<16x32xbf16>, vector<32x128xbf16>, vector<16x128xf32> -> vector<16x128xf32>
    %c0_3 = arith.constant 0 : index
    %c0_4 = arith.constant 0 : index
    %3 = vector.load %arg4[%c0_3, %c0_4] : memref<4x128xf32, #tpu.memory_space<vmem>>, vector<1x128xf32>
    %4 = vector.broadcast %3 : vector<1x128xf32> to vector<16x128xf32>
    %5 = arith.addf %2, %4 : vector<16x128xf32>
    %c0_5 = arith.constant 0 : index
    %c0_6 = arith.constant 0 : index
    %6 = vector.load %arg3[%c0_5, %c0_6] : memref<128x128xf32, #tpu.memory_space<vmem>>, vector<128x128xf32>
    %cst_7 = arith.constant dense<0.000000e+00> : vector<16x128xf32>
    %7 = tpu.matmul %5, %6, %cst_7 {dimension_numbers = #tpu.dot_dimension_numbers<[1], [0], [0], [1], [0, 0, 1, 1], [], []>} : vector<16x128xf32>, vector<128x128xf32>, vector<16x128xf32> -> vector<16x128xf32>
    %cst_8 = arith.constant 3.125000e-02 : f32
    %8 = vector.broadcast %cst_8 : f32 to vector<16x128xf32>
    %9 = arith.mulf %7, %8 : vector<16x128xf32>
    %10 = arith.subf %5, %9 : vector<16x128xf32>
    %11 = arith.mulf %10, %10 : vector<16x128xf32>
    %cst_9 = arith.constant dense<0.000000e+00> : vector<16x128xf32>
    %12 = tpu.matmul %11, %6, %cst_9 {dimension_numbers = #tpu.dot_dimension_numbers<[1], [0], [0], [1], [0, 0, 1, 1], [], []>} : vector<16x128xf32>, vector<128x128xf32>, vector<16x128xf32> -> vector<16x128xf32>
    %cst_10 = arith.constant 3.125000e-02 : f32
    %13 = vector.broadcast %cst_10 : f32 to vector<16x128xf32>
    %14 = arith.mulf %12, %13 : vector<16x128xf32>
    %cst_11 = arith.constant 9.99999974E-6 : f32
    %15 = vector.broadcast %cst_11 : f32 to vector<16x128xf32>
    %16 = arith.addf %14, %15 : vector<16x128xf32>
    %17 = math.rsqrt %16 : vector<16x128xf32>
    %18 = arith.mulf %10, %17 : vector<16x128xf32>
    %c1 = arith.constant 1 : index
    %c0_12 = arith.constant 0 : index
    %19 = vector.load %arg4[%c1, %c0_12] : memref<4x128xf32, #tpu.memory_space<vmem>>, vector<1x128xf32>
    %20 = vector.broadcast %19 : vector<1x128xf32> to vector<16x128xf32>
    %21 = arith.mulf %18, %20 : vector<16x128xf32>
    %c2 = arith.constant 2 : index
    %c0_13 = arith.constant 0 : index
    %22 = vector.load %arg4[%c2, %c0_13] : memref<4x128xf32, #tpu.memory_space<vmem>>, vector<1x128xf32>
    %23 = vector.broadcast %22 : vector<1x128xf32> to vector<16x128xf32>
    %24 = arith.addf %21, %23 : vector<16x128xf32>
    %cst_14 = arith.constant 0.000000e+00 : f32
    %25 = vector.broadcast %cst_14 : f32 to vector<16x128xf32>
    %26 = arith.cmpf ogt, %24, %25 : vector<16x128xf32>
    %c3 = arith.constant 3 : index
    %c0_15 = arith.constant 0 : index
    %27 = vector.load %arg4[%c3, %c0_15] : memref<4x128xf32, #tpu.memory_space<vmem>>, vector<1x128xf32>
    %28 = vector.broadcast %27 : vector<1x128xf32> to vector<16x128xf32>
    %29 = arith.mulf %28, %24 : vector<16x128xf32>
    %30 = arith.select %26, %24, %29 : vector<16x128xi1>, vector<16x128xf32>
    %c0_16 = arith.constant 0 : index
    %c0_17 = arith.constant 0 : index
    %31 = vector.load %arg5[%c0_16, %c0_17] : memref<16x128xf32, #tpu.memory_space<vmem>>, vector<16x128xf32>
    tpu.vector_store %arg5[%c0_16, %c0_17], %30 {strides = array<i32>} : memref<16x128xf32, #tpu.memory_space<vmem>>, vector<16x128xf32>,
    return
  }
  func.func @transform_0(%arg0: i32) -> (i32, i32) {
    %c0_i32 = arith.constant 0 : i32
    %c0_i32_0 = arith.constant 0 : i32
    return %arg0, %c0_i32 : i32, i32
  }
  func.func @transform_1(%arg0: i32) -> (i32, i32) {
    %c0_i32 = arith.constant 0 : i32
    %c0_i32_0 = arith.constant 0 : i32
    %c0_i32_1 = arith.constant 0 : i32
    return %c0_i32, %c0_i32_0 : i32, i32
  }
  func.func @transform_2(%arg0: i32) -> (i32, i32) {
    %c0_i32 = arith.constant 0 : i32
    %c0_i32_0 = arith.constant 0 : i32
    %c0_i32_1 = arith.constant 0 : i32
    return %c0_i32, %c0_i32_0 : i32, i32
  }
  func.func @transform_3(%arg0: i32) -> (i32, i32) {
    %c0_i32 = arith.constant 0 : i32
    %c0_i32_0 = arith.constant 0 : i32
    %c0_i32_1 = arith.constant 0 : i32
    return %c0_i32, %c0_i32_0 : i32, i32
  }
  func.func @transform_4(%arg0: i32) -> (i32, i32) {
    %c0_i32 = arith.constant 0 : i32
    %c0_i32_0 = arith.constant 0 : i32
    return %arg0, %c0_i32 : i32, i32
  }
}

</mosaic_0001>

<bundles_post_ra>
// kernel: tpu_custom_call.1
= control target key start
LH: loop header
LB: loop body
LE: loop exit
PB: predicated region body
PF: predicated region fallthrough
CT: control target
= control target key end

     0   :  { %9 = vsyncpa [#allocation3], 0  ;;  %s766_s0 = inlined_call_operand.hbm [shape: bf16[16,32], index: 0, kind: input, shape index: {}]   ;;  %s767_s1 = inlined_call_operand.hbm [shape: bf16[32,128], index: 1, kind: input, shape index: {}]   ;;  %s768_s2 = inlined_call_operand.hbm [shape: f32[128,128], index: 2, kind: input, shape index: {}]   ;;  %s769_s3 = inlined_call_operand.vmem [shape: f32[4,128], index: 3, kind: input, shape index: {}]   ;;  %s770_s4 = inlined_call_operand.hbm [shape: f32[16,128], index: 4, kind: output, shape index: {}]  }
   0x1   :  { %10 = vsyncpa [#allocation6], 0 }
   0x2   :  { %11 = vsyncpa [#allocation4], 0  ;;  %s658_s15 = smov [#allocation5]   ;;  %s659_s17 = smov [#allocation2]  }
   0x3   :  { %s29_s16 = sshll.u32 %s658_s15, 4  ;;  %s17_s18 = sshll.u32 %s659_s17, 4  ;;  %s30_s16 = int_to_ptr.vmem [resolvable:$true] %s29_s16  ;;  %s693_s18 = int_to_ptr.vmem [resolvable:$true] %s17_s18 }
   0x4   :  { %s564_s21 = scalar_lea.hbm %s767_s1, 256 }
   0x5   :  { %p565_p0 = scmp.ne.s32.totalorder %s767_s1, %s564_s21  ;;  %p568_p1 = scmp.lt.u32.totalorder %s564_s21, %s767_s1 }
   0x7   :  { %p570_p2 = pnand %p568_p1, %p565_p0 }
   0x9   :  { %573 = shalt.err (!%p570_p2)
}
   0xa   :  { %s574_s26 = scalar_lea.vmem %s30_s16, 256  ;;  %p579_p4 = scmp.lt.s32.totalorder %s30_s16, %s30_s16 }
   0xb   :  { %p575_p3 = scmp.ne.s32.totalorder %s30_s16, %s574_s26  ;;  %p580_p5 = scmp.lt.s32.totalorder %s574_s26, %s574_s26 }
   0xd   :  { %p581_p6 = por %p580_p5, %p579_p4 }
   0xf   :  { %p582_p7 = pnand %p581_p6, %p575_p3 }
  0x11   :  { %585 = shalt.err (!%p582_p7)
}
  0x12   :  { %s660_s27 = smov 64   ;;  %s661_s28 = smov 4  }
  0x13   :  { %35 = dma.hbm_to_vmem [thread:$0]  %s767_s1, 256, %s30_s16, [#allocation6], %s660_s27, %s660_s27, %s661_s28  }
  0x14   :  { %s586_s7 = scalar_lea.hbm %s766_s0, 128 }
  0x15   :  { %p587_p8 = scmp.ne.s32.totalorder %s766_s0, %s586_s7  ;;  %p590_p9 = scmp.lt.u32.totalorder %s586_s7, %s766_s0 }
  0x17   :  { %p592_p10 = pnand %p590_p9, %p587_p8 }
  0x19   :  { %595 = shalt.err (!%p592_p10)
}
  0x1a   :  { %s596_s12 = scalar_lea.vmem %s693_s18, 128  ;;  %p601_p12 = scmp.lt.s32.totalorder %s693_s18, %s693_s18 }
  0x1b   :  { %p597_p11 = scmp.ne.s32.totalorder %s693_s18, %s596_s12  ;;  %p602_p13 = scmp.lt.s32.totalorder %s596_s12, %s596_s12 }
  0x1d   :  { %p603_p0 = por %p602_p13, %p601_p12 }
  0x1f   :  { %p604_p1 = pnand %p603_p0, %p597_p11 }
  0x21   :  { %607 = shalt.err (!%p604_p1)
}
  0x22   :  { %23 = dma.hbm_to_vmem [thread:$0]  %s766_s0, 128, %s693_s18, [#allocation3], %s660_s27, %s660_s27, %s661_s28  }
  0x23   :  { %s662_s14 = smov [#allocation7]   ;;  %s608_s19 = scalar_lea.hbm %s768_s2, 2048 }
  0x24   :  { %s41_s15 = sshll.u32 %s662_s14, 4  ;;  %p609_p2 = scmp.ne.s32.totalorder %s768_s2, %s608_s19  ;;  %s42_s15 = int_to_ptr.vmem [resolvable:$true] %s41_s15 }
  0x25   :  { %p612_p3 = scmp.lt.u32.totalorder %s608_s19, %s768_s2 }
  0x27   :  { %p614_p4 = pnand %p612_p3, %p609_p2 }
  0x29   :  { %617 = shalt.err (!%p614_p4)
}
  0x2a   :  { %s618_s24 = scalar_lea.vmem %s42_s15, 2048  ;;  %p623_p6 = scmp.lt.s32.totalorder %s42_s15, %s42_s15 }
  0x2b   :  { %p619_p5 = scmp.ne.s32.totalorder %s42_s15, %s618_s24  ;;  %p624_p7 = scmp.lt.s32.totalorder %s618_s24, %s618_s24 }
  0x2d   :  { %p625_p8 = por %p624_p7, %p623_p6 }
  0x2f   :  { %p626_p9 = pnand %p625_p8, %p619_p5 }
  0x31   :  { %629 = shalt.err (!%p626_p9)
}
  0x32   :  { %s663_s0 = smov 128   ;;  %s664_s18 = smov 8  }
  0x33   :  { %47 = dma.hbm_to_vmem [thread:$0]  %s768_s2, 2048, %s42_s15, [#allocation6], %s663_s0, %s663_s0, %s664_s18  }
  0x34   :  { %652 = dma.done.wait [#allocation3], 128  }
  0x35   :  { %653 = vsyncadd [#allocation3], 4294967168 }
  0x36   :  { %654 = dma.done.wait [#allocation6], 2304  }
  0x37   :  { %655 = vsyncadd [#allocation6], 4294964992  ;;  %v665_v0 = vmov 0.0   ;;  %vm666_vm0 = vmmov 0   ;;  %v557_v1 = vld [vmem:[#allocation5] sm:$0xff]   ;;  %v558_v2 = vld [vmem:[#allocation5 + $0x8] sm:$0xff]  }
  0x38   :  { %405 = vmatprep.subr.bf16.mxu0 %v665_v0  ;;  %409 = vmatprep.mubr.msk.bf16.mxu0 %vm666_vm0, %v665_v0  ;;  %v133_v3 = vld [vmem:[#allocation7] sm:$0xff]  ;;  %v134_v4 = vld [vmem:[#allocation7 + $0x8] sm:$0xff]  ;;  %v135_v5 = vld [vmem:[#allocation7 + $0x10] sm:$0xff]  ;;  %vm88_vm1 = vcmask 261120   ;;  %s667_s8 = smov [#allocation8]  }
  0x39   :  { %406 = vmatpush3.bf16.msra.mxu0 %v557_v1  ;;  %v483_v6 = vpack.c.bf16 %v134_v4, %v133_v3  ;;  %v136_v7 = vld [vmem:[#allocation7 + $0x18] sm:$0xff]  ;;  %v559_v8 = vld [vmem:[#allocation2] sm:$0xff]   ;;  %v137_v10 = vld [vmem:[#allocation7 + $0x20] sm:$0xff]  ;;  %s345_s9 = sshll.u32 %s667_s8, 4  ;;  %s346_s9 = int_to_ptr.vmem [resolvable:$true] %s345_s9 }
  0x3a   :  { %407 = vmatprep.subr.bf16.mxu0 %v665_v0  ;;  %v487_v9 = vpack.c.bf16 %v136_v7, %v135_v5  ;;  %v138_v11 = vld [vmem:[#allocation7 + $0x28] sm:$0xff]  ;;  %v139_v13 = vld [vmem:[#allocation7 + $0x30] sm:$0xff]  ;;  %v140_v14 = vld [vmem:[#allocation7 + $0x38] sm:$0xff]  ;;  %s630_s10 = scalar_lea.vmem %s346_s9, 256  ;;  %p635_p11 = scmp.lt.s32.totalorder %s346_s9, %s346_s9 }
  0x3b   :  { %484 = vmatprep.subr.bf16.mxu1 %v483_v6  ;;  %v491_v12 = vpack.c.bf16 %v138_v11, %v137_v10  ;;  %v495_v15 = vpack.c.bf16 %v140_v14, %v139_v13  ;;  %v141_v16 = vld [vmem:[#allocation7 + $0x40] sm:$0xff]  ;;  %v142_v17 = vld [vmem:[#allocation7 + $0x48] sm:$0xff]  ;;  %v143_v19 = vld [vmem:[#allocation7 + $0x50] sm:$0xff]  ;;  %p631_p10 = scmp.ne.s32.totalorder %s346_s9, %s630_s10  ;;  %p636_p12 = scmp.lt.s32.totalorder %s630_s10, %s630_s10 }
  0x3c   :  { %486 = vmatpush3.bf16.msra.mxu1 %v483_v6  ;;  %v499_v18 = vpack.c.bf16 %v142_v17, %v141_v16  ;;  %v144_v20 = vld [vmem:[#allocation7 + $0x58] sm:$0xff]  ;;  %v145_v22 = vld [vmem:[#allocation7 + $0x60] sm:$0xff]  ;;  %v146_v23 = vld [vmem:[#allocation7 + $0x68] sm:$0xff] }
  0x3d   :  { %408 = vmatpush3.bf16.msra.mxu0 %v558_v2  ;;  %488 = vmatprep.subr.bf16.mxu1 %v487_v9  ;;  %v503_v21 = vpack.c.bf16 %v144_v20, %v143_v19  ;;  %v507_v24 = vpack.c.bf16 %v146_v23, %v145_v22  ;;  %v147_v25 = vld [vmem:[#allocation7 + $0x70] sm:$0xff]  ;;  %v148_v26 = vld [vmem:[#allocation7 + $0x78] sm:$0xff]  ;;  %v358_v28 = vld [vmem:[%s769_s3] ss:$0 sm:$0xff]  ;;  %p637_p13 = por %p636_p12, %p635_p11 }
  0x3e   :  { %516 = vmatprep.subr.bf16.mxu0 %v483_v6  ;;  %v511_v27 = vpack.c.bf16 %v148_v26, %v147_v25  ;;  %v363_v50 = vld [vmem:[%s769_s3 + $0x1] ss:$0 sm:$0xff]  ;;  %v364_v54 = vld [vmem:[%s769_s3 + $0x2] ss:$0 sm:$0xff]  ;;  %v365_v57 = vld [vmem:[%s769_s3 + $0x3] ss:$0 sm:$0xff] }
  0x3f   :  { %p638_p0 = pnand %p637_p13, %p631_p10 }
  0x40   :  { %410 = vmatmul.mubr.msk.bf16.vlgmr.msra.gmra.mrb[0].mxu0 %vm88_vm1, %v559_v8  ;;  %490 = vmatpush3.bf16.msra.mxu1 %v487_v9 }
  0x41   :  { %518 = vmatpush3.bf16.msra.mxu0 %v483_v6  ;;  %492 = vmatprep.subr.bf16.mxu1 %v491_v12 }
  0x42   :  { %520 = vmatprep.subr.bf16.mxu0 %v487_v9 }
  0x44   :  { %494 = vmatpush3.bf16.msra.mxu1 %v491_v12 }
  0x45   :  { %522 = vmatpush3.bf16.msra.mxu0 %v487_v9  ;;  %496 = vmatprep.subr.bf16.mxu1 %v495_v15 }
  0x46   :  { %524 = vmatprep.subr.bf16.mxu0 %v491_v12 }
  0x48   :  { %498 = vmatpush3.bf16.msra.mxu1 %v495_v15 }
  0x49   :  { %526 = vmatpush3.bf16.msra.mxu0 %v491_v12  ;;  %500 = vmatprep.subr.bf16.mxu1 %v499_v18 }
  0x4a   :  { %528 = vmatprep.subr.bf16.mxu0 %v495_v15 }
  0x4c   :  { %502 = vmatpush3.bf16.msra.mxu1 %v499_v18 }
  0x4d   :  { %530 = vmatpush3.bf16.msra.mxu0 %v495_v15  ;;  %504 = vmatprep.subr.bf16.mxu1 %v503_v21 }
  0x4e   :  { %532 = vmatprep.subr.bf16.mxu0 %v499_v18 }
  0x50   :  { %506 = vmatpush3.bf16.msra.mxu1 %v503_v21 }
  0x51   :  { %534 = vmatpush3.bf16.msra.mxu0 %v499_v18  ;;  %508 = vmatprep.subr.bf16.mxu1 %v507_v24 }
  0x52   :  { %536 = vmatprep.subr.bf16.mxu0 %v503_v21 }
  0x54   :  { %510 = vmatpush3.bf16.msra.mxu1 %v507_v24 }
  0x55   :  { %538 = vmatpush3.bf16.msra.mxu0 %v503_v21  ;;  %512 = vmatprep.subr.bf16.mxu1 %v511_v27 }
  0x56   :  { %540 = vmatprep.subr.bf16.mxu0 %v507_v24 }
  0x58   :  { %514 = vmatpush3.bf16.msra.mxu1 %v511_v27 }
  0x59   :  { %542 = vmatpush3.bf16.msra.mxu0 %v507_v24 }
  0x5a   :  { %544 = vmatprep.subr.bf16.mxu0 %v511_v27 }
  0x5d   :  { %546 = vmatpush3.bf16.msra.mxu0 %v511_v27 }
 0x113   :  { %v126_v29 = vpop.f32.mrb[0].mxu0 }
 0x114   :  { %v127_v30 = vadd.f32 %v358_v28, %v126_v29  ;;  %v411_v31 = vpop.f32.mrb[1].mxu0 }
 0x115   :  { %v129_v32 = vpop.f32.mrb[2].mxu0 }
 0x116   :  { %v130_v33 = vadd.f32 %v358_v28, %v129_v32  ;;  %v412_v34 = vpop.f32.mrb[3].mxu0  ;;  %445 = vmatprep.mubr.f32.mxu1 %v127_v30 }
 0x118   :  { %446 = vmatmul.mubr.f32.vlgmr.msra.gmra.mrb[0].mxu1 %v130_v33 }
 0x1eb   :  { %v447_v35 = vpop.f32.mrb[0].mxu1 }
 0x1ec   :  { %v225_v36 = vmul.f32 0.03125, %v447_v35  ;;  %v215_v37 = vpop.f32.mrb[1].mxu1 }
 0x1ed   :  { %v224_v38 = vmul.f32 0.03125, %v215_v37 }
 0x1ee   :  { %v227_v39 = vsub.f32 %v130_v33, %v225_v36 }
 0x1ef   :  { %v226_v40 = vsub.f32 %v127_v30, %v224_v38 }
 0x1f0   :  { %v229_v42 = vmul.f32 %v227_v39, %v227_v39 }
 0x1f1   :  { %v228_v41 = vmul.f32 %v226_v40, %v226_v40 }
 0x1f3   :  { %480 = vmatprep.mubr.f32.mxu0 %v228_v41 }
 0x1f4   :  { %481 = vmatmul.mubr.f32.vlgmr.msra.gmra.mrb[4].mxu0 %v229_v42 }
 0x2c7   :  { %v482_v43 = vpop.f32.mrb[4].mxu0 }
 0x2c8   :  { %v306_v44 = vmul.f32 0.03125, %v482_v43  ;;  %v296_v45 = vpop.f32.mrb[5].mxu0 }
 0x2c9   :  { %v305_v46 = vmul.f32 0.03125, %v296_v45 }
 0x2ca   :  { %v308_v47 = vadd.f32 1e-05, %v306_v44 }
 0x2cb   :  { %v307_v48 = vadd.f32 1e-05, %v305_v46 }
 0x2cc   :  { %560 = vrsqrt.f32 %v308_v47 }
 0x2cd   :  { %562 = vrsqrt.f32 %v307_v48 }
 0x2d6   :  { %v561_v49 = vpop.eup %560 }
 0x2d7   :  { %v563_v51 = vpop.eup %562  ;;  %v312_v52 = vmul.f32 %v561_v49, %v227_v39 }
 0x2d8   :  { %v311_v53 = vmul.f32 %v563_v51, %v226_v40 }
 0x2d9   :  { %v319_v55 = vmul.f32 %v363_v50, %v312_v52 }
 0x2da   :  { %v318_v56 = vmul.f32 %v363_v50, %v311_v53 }
 0x2db   :  { %v326_v58 = vadd.f32 %v364_v54, %v319_v55 }
 0x2dc   :  { %v325_v59 = vadd.f32 %v364_v54, %v318_v56 }
 0x2dd   :  { %vm328_vm2 = vcmp.gt.f32.partialorder %v326_v58, 0.0  ;;  %v335_v60 = vmul.f32 %v365_v57, %v326_v58 }
 0x2de   :  { %vm327_vm3 = vcmp.gt.f32.partialorder %v325_v59, 0.0  ;;  %v334_v61 = vmul.f32 %v365_v57, %v325_v59 }
 0x2df   :  { %v337_v62 = vsel %vm328_vm2, %v326_v58, %v335_v60 }
 0x2e0   :  { %v336_v63 = vsel %vm327_vm3, %v325_v59, %v334_v61  ;;  %339 = vst [vmem:[#allocation8 + $0x8] sm:$0xff] %v337_v62 }
 0x2e1   :  { %338 = vst [vmem:[#allocation8] sm:$0xff] %v336_v63 }
 0x2e2   :  { %641 = shalt.err (!%p638_p0)
}
 0x2e3   :  { %s642_s12 = scalar_lea.hbm %s770_s4, 256 }
 0x2e4   :  { %p643_p1 = scmp.ne.s32.totalorder %s770_s4, %s642_s12  ;;  %p646_p2 = scmp.lt.u32.totalorder %s642_s12, %s770_s4 }
 0x2e6   :  { %p648_p3 = pnand %p646_p2, %p643_p1 }
 0x2e8   :  { %651 = shalt.err (!%p648_p3)
}
 0x2e9   :  { %351 = dma.vmem_to_hbm [thread:$0]  %s346_s9, 256, %s770_s4, [#allocation4], %s663_s0, %s663_s0, %s664_s18  }
 0x2ea   :  { %656 = dma.done.wait [#allocation4], 256  }
 0x2eb   :  { %657 = vsyncadd [#allocation4], 4294967040 }
 0x2ec   :  { %355 = vsyncpa [#allocation3], 1 }
 0x2ed   :  { %356 = vsyncpa [#allocation6], 1 }
 0x2ee   :  { %357 = vsyncpa [#allocation4], 1 }

</bundles_post_ra>
